<compile_context>
chip_gen: v7x
topology: tpu7x:2x2x1
jax: 0.10.0
libtpu: 0.0.40
codegen_flags: <defaults>
</compile_context>

<pallas_src>
import functools

import jax
import jax.numpy as jnp
from jax.experimental import pallas as pl
from jax.experimental.pallas import tpu as pltpu


def _softmax_kernel(x_ref, o_ref, *, apply_log):
    # Load the (tm, D) tile, compute in f32 regardless of storage dtype.
    x = x_ref[...].astype(jnp.float32)

    m = jnp.max(x, axis=-1, keepdims=True)          # (tm, 1)
    z = x - m
    e = jnp.exp(z)                                  # 1 transcendental / element
    s = jnp.sum(e, axis=-1, keepdims=True)          # (tm, 1)

    if apply_log:
        # log-softmax computed analytically: no per-element log / divide.
        out = z - jnp.log(s)
    else:
        inv = 1.0 / s                               # per-row only (tm elements)
        out = e * inv

    o_ref[...] = out.astype(o_ref.dtype)


def _choose_tile_rows(r, d, itemsize, *, max_tile_rows, vmem_budget_bytes):
    """Largest row tile whose double-buffered in+out blocks fit the VMEM budget."""
    per_row_bytes = 2 * 2 * d * itemsize            # (in + out) x double-buffer
    tm = vmem_budget_bytes // max(per_row_bytes, 1)
    tm = min(tm, max_tile_rows, r)
    if tm >= r:
        return r                                    # single full-extent block
    # Keep the sublane dim aligned to the dtype's native packing (8/16/32 rows).
    min_rows = max(8, 32 // max(itemsize, 1))
    return max(min_rows, (tm // min_rows) * min_rows)


def softmax(x, *, apply_log=False, dim=-1, max_tile_rows=2048,
            vmem_budget_bytes=8 * 1024 * 1024):
    """(Log-)Softmax over `dim` of a 2d/3d/4d tensor via a Pallas TPU kernel."""
    # TODO(synk): for non-default `dim`, the torch module applies `dim` to the
    # reshaped 3d view of a 4d input; here `dim` refers to the original axes
    # (identical behavior for the default dim=-1).
    orig_ndim = x.ndim
    axis = dim % orig_ndim
    if axis != orig_ndim - 1:
        x = jnp.moveaxis(x, axis, -1)
    work_shape = x.shape

    d = work_shape[-1]
    x2 = x.reshape(-1, d)                           # keep native dtype in HBM
    r = x2.shape[0]

    tm = _choose_tile_rows(
        r, d, x2.dtype.itemsize,
        max_tile_rows=max_tile_rows, vmem_budget_bytes=vmem_budget_bytes,
    )
    grid = (pl.cdiv(r, tm),)

    kernel = functools.partial(_softmax_kernel, apply_log=bool(apply_log))

    out = pl.pallas_call(
        kernel,
        out_shape=jax.ShapeDtypeStruct((r, d), x2.dtype),
        grid_spec=pltpu.PrefetchScalarGridSpec(
            num_scalar_prefetch=0,
            grid=grid,
            in_specs=[pl.BlockSpec((tm, d), lambda i: (i, 0))],
            out_specs=pl.BlockSpec((tm, d), lambda i: (i, 0)),
        ),
        compiler_params=pltpu.CompilerParams(
            # Row tiles are independent -> let v7x shard across its 2 TCs.
            dimension_semantics=("parallel",),
        ),
    )(x2)

    out = out.reshape(work_shape)
    if axis != orig_ndim - 1:
        out = jnp.moveaxis(out, -1, axis)
    return out


if __name__ == "__main__":
    key = jax.random.PRNGKey(0)
    k1, k2 = jax.random.split(key)

    # 3-D input (batch, time, feats) with a lane-dense last dim.
    x = jax.random.normal(k1, (2, 16, 128), dtype=jnp.float32)
    y = jax.block_until_ready(softmax(x, apply_log=False))
    ref = jax.nn.softmax(x, axis=-1)
    assert y.shape == x.shape and y.dtype == x.dtype
    assert bool(jnp.allclose(jnp.sum(y, axis=-1), 1.0, atol=1e-5))
    assert bool(jnp.allclose(y, ref, atol=1e-5, rtol=1e-5))

    # Log-softmax path, non-128 last dim, and a forced multi-tile grid
    # (last tile is partial) to exercise the tiled path.
    x2 = jax.random.normal(k2, (10, 50, 40), dtype=jnp.float32)
    y2 = jax.block_until_ready(softmax(x2, apply_log=True, max_tile_rows=64))
    ref2 = jax.nn.log_softmax(x2, axis=-1)
    assert y2.shape == x2.shape and y2.dtype == x2.dtype
    assert bool(jnp.allclose(y2, ref2, atol=1e-5, rtol=1e-5))

    print("KERNEL_OK")
</pallas_src>

<mosaic_0001>
module attributes {stable_mosaic.version = 11 : i64} {
  func.func @_softmax_kernel(%arg0: i32, %arg1: memref<32x128xf32, #tpu.memory_space<vmem>>, %arg2: memref<32x128xf32, #tpu.memory_space<vmem>>) attributes {dimension_semantics = [#tpu.dimension_semantics<parallel>], iteration_bounds = array<i64: 1>, scalar_prefetch = 0 : i64, scratch_operands = 0 : i64, tpu.core_type = #tpu.core_type<tc>, window_params = [{transform_indices = @transform_0, window_bounds = array<i64: 32, 128>}, {transform_indices = @transform_1, window_bounds = array<i64: 32, 128>}]} {
    %c0 = arith.constant 0 : index
    %c0_0 = arith.constant 0 : index
    %0 = vector.load %arg1[%c0, %c0_0] : memref<32x128xf32, #tpu.memory_space<vmem>>, vector<32x128xf32>
    %cst = arith.constant dense<0xFF800000> : vector<32xf32>
    %1 = vector.multi_reduction <maximumf>, %0, %cst [1] : vector<32x128xf32> to vector<32xf32>
    %2 = vector.shape_cast %1 : vector<32xf32> to vector<32x1xf32>
    %3 = vector.broadcast %2 : vector<32x1xf32> to vector<32x128xf32>
    %4 = arith.subf %0, %3 : vector<32x128xf32>
    %5 = math.exp %4 : vector<32x128xf32>
    %cst_1 = arith.constant dense<0.000000e+00> : vector<32xf32>
    %6 = vector.multi_reduction <add>, %5, %cst_1 [1] : vector<32x128xf32> to vector<32xf32>
    %7 = vector.shape_cast %6 : vector<32xf32> to vector<32x1xf32>
    %cst_2 = arith.constant 1.000000e+00 : f32
    %8 = vector.broadcast %cst_2 : f32 to vector<32x1xf32>
    %9 = arith.divf %8, %7 : vector<32x1xf32>
    %10 = vector.broadcast %9 : vector<32x1xf32> to vector<32x128xf32>
    %11 = arith.mulf %5, %10 : vector<32x128xf32>
    %c0_3 = arith.constant 0 : index
    %c0_4 = arith.constant 0 : index
    %12 = vector.load %arg2[%c0_3, %c0_4] : memref<32x128xf32, #tpu.memory_space<vmem>>, vector<32x128xf32>
    tpu.vector_store %arg2[%c0_3, %c0_4], %11 {strides = array<i32>} : memref<32x128xf32, #tpu.memory_space<vmem>>, vector<32x128xf32>,
    return
  }
  func.func @transform_0(%arg0: i32) -> (i32, i32) {
    %c0_i32 = arith.constant 0 : i32
    %c0_i32_0 = arith.constant 0 : i32
    return %arg0, %c0_i32 : i32, i32
  }
  func.func @transform_1(%arg0: i32) -> (i32, i32) {
    %c0_i32 = arith.constant 0 : i32
    %c0_i32_0 = arith.constant 0 : i32
    return %arg0, %c0_i32 : i32, i32
  }
}

</mosaic_0001>

<bundles_post_ra>
// kernel: tpu_custom_call.1
= control target key start
LH: loop header
LB: loop body
LE: loop exit
PB: predicated region body
PF: predicated region fallthrough
CT: control target
= control target key end

     0   :  { %6 = vsyncpa [#allocation3], 0  ;;  %s200_s0 = inlined_call_operand.hbm [shape: f32[32,128], index: 0, kind: input, shape index: {}]   ;;  %s201_s1 = inlined_call_operand.hbm [shape: f32[32,128], index: 1, kind: output, shape index: {}]  }
   0x1   :  { %7 = vsyncpa [#allocation4], 0  ;;  %s156_s6 = smov [#allocation2]   ;;  %s108_s10 = scalar_lea.hbm %s200_s0, 512 }
   0x2   :  { %s13_s7 = sshll.u32 %s156_s6, 4  ;;  %p109_p0 = scmp.ne.s32.totalorder %s200_s0, %s108_s10  ;;  %s14_s7 = int_to_ptr.vmem [resolvable:$true] %s13_s7 }
   0x3   :  { %p112_p1 = scmp.lt.u32.totalorder %s108_s10, %s200_s0 }
   0x5   :  { %p114_p2 = pnand %p112_p1, %p109_p0 }
   0x7   :  { %117 = shalt.err (!%p114_p2)
}
   0x8   :  { %s118_s15 = scalar_lea.vmem %s14_s7, 512  ;;  %p123_p4 = scmp.lt.s32.totalorder %s14_s7, %s14_s7 }
   0x9   :  { %p119_p3 = scmp.ne.s32.totalorder %s14_s7, %s118_s15  ;;  %p124_p5 = scmp.lt.s32.totalorder %s118_s15, %s118_s15 }
   0xb   :  { %p125_p6 = por %p124_p5, %p123_p4 }
   0xd   :  { %p126_p7 = pnand %p125_p6, %p119_p3 }
   0xf   :  { %129 = shalt.err (!%p126_p7)
}
  0x10   :  { %s157_s16 = smov 128   ;;  %s158_s17 = smov 8  }
  0x11   :  { %19 = dma.hbm_to_vmem [thread:$0]  %s200_s0, 512, %s14_s7, [#allocation3], %s157_s16, %s157_s16, %s158_s17  }
  0x12   :  { %152 = dma.done.wait [#allocation3], 512  }
  0x13   :  { %153 = vsyncadd [#allocation3], 4294966784  ;;  %v23_v0 = vld [vmem:[#allocation2] sm:$0xff]  ;;  %v25_v1 = vld [vmem:[#allocation2 + $0x10] sm:$0xff]  ;;  %s159_s0 = smov [#allocation5]  }
  0x14   :  { %27 = vmax.xlane.f32.xlu0 %v23_v0  ;;  %31 = vmax.xlane.f32.xlu1 %v25_v1  ;;  %v24_v2 = vld [vmem:[#allocation2 + $0x8] sm:$0xff]  ;;  %v26_v3 = vld [vmem:[#allocation2 + $0x18] sm:$0xff]  ;;  %s76_s20 = sshll.u32 %s159_s0, 4  ;;  %s77_s20 = int_to_ptr.vmem [resolvable:$true] %s76_s20 }
  0x15   :  { %s130_s21 = scalar_lea.vmem %s77_s20, 512  ;;  %p135_p9 = scmp.lt.s32.totalorder %s77_s20, %s77_s20 }
  0x16   :  { %p131_p8 = scmp.ne.s32.totalorder %s77_s20, %s130_s21  ;;  %p136_p10 = scmp.lt.s32.totalorder %s130_s21, %s130_s21 }
  0x18   :  { %29 = vmax.xlane.f32.xlu0 %v24_v2  ;;  %33 = vmax.xlane.f32.xlu1 %v26_v3  ;;  %p137_p11 = por %p136_p10, %p135_p9 }
  0x1a   :  { %p138_p12 = pnand %p137_p11, %p131_p8 }
  0xa1   :  { %v28_v4 = vpop.xlane.xlu0 %27  ;;  %v32_v5 = vpop.xlane.xlu1 %31 }
  0xa2   :  { %v35_v6 = vsub.f32 %v23_v0, %v28_v4  ;;  %v37_v7 = vsub.f32 %v25_v1, %v32_v5 }
  0xa4   :  { %v39_v8 = vmul.f32 1.442695, %v35_v6  ;;  %v43_v9 = vmul.f32 1.442695, %v37_v7 }
  0xa5   :  { %v30_v10 = vpop.xlane.xlu0 %29  ;;  %v34_v11 = vpop.xlane.xlu1 %33 }
  0xa6   :  { %92 = vpow2.f32 %v39_v8  ;;  %v36_v12 = vsub.f32 %v24_v2, %v30_v10  ;;  %v38_v13 = vsub.f32 %v26_v3, %v34_v11 }
  0xa7   :  { %94 = vpow2.f32 %v43_v9 }
  0xa8   :  { %v41_v14 = vmul.f32 1.442695, %v36_v12  ;;  %v45_v15 = vmul.f32 1.442695, %v38_v13 }
  0xaa   :  { %96 = vpow2.f32 %v41_v14 }
  0xab   :  { %98 = vpow2.f32 %v45_v15 }
  0xb0   :  { %v93_v16 = vpop.eup %92 }
  0xb1   :  { %47 = vadd.xlane.f32.xlu0 %v93_v16  ;;  %v95_v17 = vpop.eup %94 }
  0xb4   :  { %v97_v18 = vpop.eup %96 }
  0xb5   :  { %51 = vadd.xlane.f32.xlu0 %v95_v17  ;;  %49 = vadd.xlane.f32.xlu1 %v97_v18  ;;  %v99_v19 = vpop.eup %98 }
  0xb9   :  { %53 = vadd.xlane.f32.xlu1 %v99_v19 }
 0x13e   :  { %v48_v20 = vpop.xlane.xlu0 %47 }
 0x13f   :  { %100 = vrcp.f32 %v48_v20 }
 0x142   :  { %v50_v21 = vpop.xlane.xlu1 %49  ;;  %v52_v22 = vpop.xlane.xlu0 %51 }
 0x143   :  { %102 = vrcp.f32 %v50_v21 }
 0x144   :  { %104 = vrcp.f32 %v52_v22 }
 0x146   :  { %v54_v23 = vpop.xlane.xlu1 %53 }
 0x147   :  { %106 = vrcp.f32 %v54_v23 }
 0x149   :  { %v101_v24 = vpop.eup %100 }
 0x14a   :  { %v63_v25 = vmul.f32 %v101_v24, %v93_v16 }
 0x14c   :  { %67 = vst [vmem:[#allocation5] sm:$0xff] %v63_v25 }
 0x14d   :  { %v103_v26 = vpop.eup %102 }
 0x14e   :  { %v105_v27 = vpop.eup %104  ;;  %v64_v28 = vmul.f32 %v103_v26, %v97_v18 }
 0x14f   :  { %v65_v29 = vmul.f32 %v105_v27, %v95_v17 }
 0x150   :  { %68 = vst [vmem:[#allocation5 + $0x8] sm:$0xff] %v64_v28 }
 0x151   :  { %v107_v30 = vpop.eup %106  ;;  %69 = vst [vmem:[#allocation5 + $0x10] sm:$0xff] %v65_v29 }
 0x152   :  { %v66_v31 = vmul.f32 %v107_v30, %v99_v19 }
 0x154   :  { %70 = vst [vmem:[#allocation5 + $0x18] sm:$0xff] %v66_v31 }
 0x155   :  { %141 = shalt.err (!%p138_p12)
}
 0x156   :  { %s142_s24 = scalar_lea.hbm %s201_s1, 512 }
 0x157   :  { %p143_p13 = scmp.ne.s32.totalorder %s201_s1, %s142_s24  ;;  %p146_p0 = scmp.lt.u32.totalorder %s142_s24, %s201_s1 }
 0x159   :  { %p148_p1 = pnand %p146_p0, %p143_p13 }
 0x15b   :  { %151 = shalt.err (!%p148_p1)
}
 0x15c   :  { %82 = dma.vmem_to_hbm [thread:$0]  %s77_s20, 512, %s201_s1, [#allocation4], %s157_s16, %s157_s16, %s158_s17  }
 0x15d   :  { %154 = dma.done.wait [#allocation4], 512  }
 0x15e   :  { %155 = vsyncadd [#allocation4], 4294966784 }
 0x15f   :  { %86 = vsyncpa [#allocation3], 1 }
 0x160   :  { %87 = vsyncpa [#allocation4], 1 }

</bundles_post_ra>
